<compile_context>
chip_gen: v7x
topology: tpu7x:2x2x1
jax: 0.10.0
libtpu: 0.0.40
codegen_flags: <defaults>
</compile_context>

<pallas_src>
import jax
import jax.numpy as jnp
from jax.experimental import pallas as pl
from jax.experimental.pallas import tpu as pltpu


def _linear_c1_kernel(x_ref, w_ref, b_ref, o_ref):
    # x_ref: [bm, F] VMEM, w_ref: [1, F] VMEM, b_ref: [1, 1] SMEM, o_ref: [bm, 1]
    # VPU multiply + row reduction; no MXU push/pop for a single output column.
    acc = jnp.sum(
        x_ref[...].astype(jnp.float32) * w_ref[...].astype(jnp.float32),
        axis=-1,
        keepdims=True,
    )
    o_ref[...] = (acc + b_ref[0, 0]).astype(o_ref.dtype)


def _linear_mxu_kernel(x_ref, w_ref, b_ref, o_ref):
    # x_ref: [bm, F], w_ref: [F, C], b_ref: [1, C], o_ref: [bm, C]
    acc = jnp.dot(x_ref[...], w_ref[...], preferred_element_type=jnp.float32)
    o_ref[...] = (acc + b_ref[...].astype(jnp.float32)).astype(o_ref.dtype)


def regression_forward(x, weight, bias, *, block_b=512):
    """nn.Linear forward.

    x:      [B, F]
    weight: [C, F]  (nn.Linear layout)
    bias:   [C]
    returns [B, C]
    """
    B, F = x.shape
    C, F2 = weight.shape
    assert F == F2 and bias.shape == (C,)

    # Batch tiling: one full-extent block when small, else 512-row tiles
    # (multiple of 8, so the (8,128) BlockSpec rule is satisfied on ragged B).
    bm = B if B <= block_b else block_b
    grid = (pl.cdiv(B, bm),)

    itemsize = jnp.dtype(x.dtype).itemsize
    cost = pl.CostEstimate(
        flops=2 * B * F * C,
        transcendentals=0,
        bytes_accessed=(B * F + F * C + C + B * C) * itemsize,
    )

    # VMEM budget: double-buffered x + out tiles, plus the resident weight tile.
    vmem_bytes = (
        2 * bm * F * itemsize          # x tiles (double-buffered)
        + 2 * bm * max(C, 128) * 4     # out tiles (lane-padded, f32 worst case)
        + F * max(C, 128) * 4          # resident weight
        + (1 << 20)                    # slack
    )
    vmem_bytes = int(min(max(vmem_bytes, 4 << 20), 48 << 20))

    cparams = pltpu.CompilerParams(
        dimension_semantics=("parallel",),   # megacore batch sharding on v7x
        vmem_limit_bytes=vmem_bytes,
    )

    if C == 1:
        # VPU-reduce path; weight stays in its native [1, F] layout (no transpose),
        # bias is a single scalar in SMEM.
        b_smem = bias.reshape(1, 1)
        return pl.pallas_call(
            _linear_c1_kernel,
            out_shape=jax.ShapeDtypeStruct((B, 1), x.dtype),
            grid=grid,
            in_specs=[
                pl.BlockSpec((bm, F), lambda i: (i, 0)),
                pl.BlockSpec((1, F), lambda i: (0, 0)),
                pl.BlockSpec(memory_space=pltpu.MemorySpace.SMEM),
            ],
            out_specs=pl.BlockSpec((bm, 1), lambda i: (i, 0)),
            compiler_params=cparams,
            cost_estimate=cost,
        )(x, weight, b_smem)

    # General path: MXU matmul against the pre-transposed weight.
    w_t = weight.T            # [F, C]
    b2d = bias.reshape(1, C)  # [1, C]
    return pl.pallas_call(
        _linear_mxu_kernel,
        out_shape=jax.ShapeDtypeStruct((B, C), x.dtype),
        grid=grid,
        in_specs=[
            pl.BlockSpec((bm, F), lambda i: (i, 0)),
            pl.BlockSpec((F, C), lambda i: (0, 0)),
            pl.BlockSpec((1, C), lambda i: (0, 0)),
        ],
        out_specs=pl.BlockSpec((bm, C), lambda i: (i, 0)),
        compiler_params=cparams,
        cost_estimate=cost,
    )(x, w_t, b2d)


if __name__ == "__main__":
    key = jax.random.PRNGKey(0)
    kx, kw, kb = jax.random.split(key, 3)

    batch = 8
    input_feature = 32
    num_classes = 1  # module default

    # Deterministic synthetic parameters (nn.Linear: weight [C, F], bias [C]).
    x = jax.random.normal(kx, (batch, input_feature), dtype=jnp.float32)
    weight = jax.random.normal(kw, (num_classes, input_feature), dtype=jnp.float32) * 0.1
    bias = jax.random.normal(kb, (num_classes,), dtype=jnp.float32) * 0.1

    out = regression_forward(x, weight, bias)
    out = jax.block_until_ready(out)

    ref = x @ weight.T + bias
    assert out.shape == (batch, num_classes)
    assert jnp.allclose(out, ref, atol=1e-5, rtol=1e-5)

    # Also exercise the general (num_classes > 1) MXU path.
    c2 = 4
    w2 = jax.random.normal(kw, (c2, input_feature), dtype=jnp.float32) * 0.1
    b2 = jax.random.normal(kb, (c2,), dtype=jnp.float32) * 0.1
    out2 = jax.block_until_ready(regression_forward(x, w2, b2))
    ref2 = x @ w2.T + b2
    assert out2.shape == (batch, c2)
    assert jnp.allclose(out2, ref2, atol=1e-5, rtol=1e-5)

    print("KERNEL_OK")
</pallas_src>

<mosaic_0001>
module attributes {stable_mosaic.version = 11 : i64} {
  func.func @_linear_c1_kernel(%arg0: i32, %arg1: memref<8x32xf32, #tpu.memory_space<vmem>>, %arg2: memref<1x32xf32, #tpu.memory_space<vmem>>, %arg3: memref<1x1xf32, #tpu.memory_space<smem>>, %arg4: memref<8x1xf32, #tpu.memory_space<vmem>>) attributes {dimension_semantics = [#tpu.dimension_semantics<parallel>], iteration_bounds = array<i64: 1>, scalar_prefetch = 0 : i64, scratch_operands = 0 : i64, tpu.core_type = #tpu.core_type<tc>, window_params = [{transform_indices = @transform_0, window_bounds = array<i64: 8, 32>}, {pipeline_mode = #tpu.pipeline_mode<synchronous>, transform_indices = @transform_1, window_bounds = array<i64: 1, 32>}, {transform_indices = @transform_2, window_bounds = array<i64: 1, 1>}, {transform_indices = @transform_3, window_bounds = array<i64: 8, 1>}]} {
    %c0 = arith.constant 0 : index
    %c0_0 = arith.constant 0 : index
    %0 = vector.load %arg1[%c0, %c0_0] : memref<8x32xf32, #tpu.memory_space<vmem>>, vector<8x32xf32>
    %c0_1 = arith.constant 0 : index
    %c0_2 = arith.constant 0 : index
    %1 = vector.load %arg2[%c0_1, %c0_2] : memref<1x32xf32, #tpu.memory_space<vmem>>, vector<1x32xf32>
    %2 = vector.broadcast %1 : vector<1x32xf32> to vector<8x32xf32>
    %3 = arith.mulf %0, %2 : vector<8x32xf32>
    %cst = arith.constant dense<0.000000e+00> : vector<8xf32>
    %4 = vector.multi_reduction <add>, %3, %cst [1] : vector<8x32xf32> to vector<8xf32>
    %5 = vector.shape_cast %4 : vector<8xf32> to vector<8x1xf32>
    %c0_3 = arith.constant 0 : index
    %c0_4 = arith.constant 0 : index
    %6 = memref.load %arg3[%c0_3, %c0_4] : memref<1x1xf32, #tpu.memory_space<smem>>
    %7 = vector.broadcast %6 : f32 to vector<8x1xf32>
    %8 = arith.addf %5, %7 : vector<8x1xf32>
    %c0_5 = arith.constant 0 : index
    %c0_6 = arith.constant 0 : index
    %9 = vector.load %arg4[%c0_5, %c0_6] : memref<8x1xf32, #tpu.memory_space<vmem>>, vector<8x1xf32>
    tpu.vector_store %arg4[%c0_5, %c0_6], %8 {strides = array<i32>} : memref<8x1xf32, #tpu.memory_space<vmem>>, vector<8x1xf32>,
    return
  }
  func.func @transform_0(%arg0: i32) -> (i32, i32) {
    %c0_i32 = arith.constant 0 : i32
    %c0_i32_0 = arith.constant 0 : i32
    return %arg0, %c0_i32 : i32, i32
  }
  func.func @transform_1(%arg0: i32) -> (i32, i32) {
    %c0_i32 = arith.constant 0 : i32
    %c0_i32_0 = arith.constant 0 : i32
    %c0_i32_1 = arith.constant 0 : i32
    return %c0_i32, %c0_i32_0 : i32, i32
  }
  func.func @transform_2(%arg0: i32) -> (i32, i32) {
    %c0_i32 = arith.constant 0 : i32
    %c0_i32_0 = arith.constant 0 : i32
    %c0_i32_1 = arith.constant 0 : i32
    return %c0_i32, %c0_i32_0 : i32, i32
  }
  func.func @transform_3(%arg0: i32) -> (i32, i32) {
    %c0_i32 = arith.constant 0 : i32
    %c0_i32_0 = arith.constant 0 : i32
    return %arg0, %c0_i32 : i32, i32
  }
}

</mosaic_0001>

<bundles_post_ra>
// kernel: tpu_custom_call.1
= control target key start
LH: loop header
LB: loop body
LE: loop exit
PB: predicated region body
PF: predicated region fallthrough
CT: control target
= control target key end

     0   :  { %9 = vsyncpa [#allocation4], 0  ;;  %s76_s12 = smov [#allocation3]   ;;  %s118_s0 = inlined_call_operand.hbm [shape: f32[8,32], index: 0, kind: input, shape index: {}]   ;;  %s119_s1 = inlined_call_operand.vmem [shape: f32[1,32], index: 1, kind: input, shape index: {}]   ;;  %s120_s2 = inlined_call_operand.<no memory space> [shape: f32[1,1], index: 2, kind: input, shape index: {}]   ;;  %s121_s3 = inlined_call_operand.vmem [shape: f32[8,1], index: 3, kind: output, shape index: {}]  }
   0x1   :  { %s16_s13 = sshll.u32 %s76_s12, 4  ;;  %s52_s16 = scalar_lea.hbm %s118_s0, 128  ;;  %s17_s13 = int_to_ptr.vmem [resolvable:$true] %s16_s13 }
   0x2   :  { %p53_p0 = scmp.ne.s32.totalorder %s118_s0, %s52_s16  ;;  %p56_p1 = scmp.lt.u32.totalorder %s52_s16, %s118_s0 }
   0x4   :  { %p58_p2 = pnand %p56_p1, %p53_p0 }
   0x6   :  { %61 = shalt.err (!%p58_p2)
}
   0x7   :  { %s62_s21 = scalar_lea.vmem %s17_s13, 128  ;;  %p67_p4 = scmp.lt.s32.totalorder %s17_s13, %s17_s13 }
   0x8   :  { %p63_p3 = scmp.ne.s32.totalorder %s17_s13, %s62_s21  ;;  %p68_p5 = scmp.lt.s32.totalorder %s62_s21, %s62_s21 }
   0xa   :  { %p69_p6 = por %p68_p5, %p67_p4 }
   0xc   :  { %p70_p7 = pnand %p69_p6, %p63_p3 }
   0xe   :  { %73 = shalt.err (!%p70_p7)
}
   0xf   :  { %19 = dma.hbm_to_vmem [thread:$0]  %s118_s0, 128, %s17_s13, [#allocation4]  }
  0x10   :  { %74 = dma.done.wait [#allocation4], 128  }
  0x11   :  { %75 = vsyncadd [#allocation4], 4294967168  ;;  %v27_v0 = vld [vmem:[#allocation3] sm:$0xff]  ;;  %vm36_vm0 = vcmask 261120   ;;  %v41_v4 = vstv %s120_s2  ;;  %vm43_vm1 = vcmask 7168  }
  0x12   :  { %v50_v1 = vld [vmem:[%s119_s1] ss:$0 sm:$0xff] }
  0x13   :  { %v35_v2 = vmul.f32 %v50_v1, %v27_v0 }
  0x15   :  { %v37_v3 = vsel %vm36_vm0, %v35_v2, 0.0 }
  0x16   :  { %38 = vadd.xlane.f32.xlu0 %v37_v3 }
  0xa3   :  { %v39_v5 = vpop.xlane.xlu0 %38 }
  0xa4   :  { %v42_v6 = vadd.f32 %v41_v4, %v39_v5 }
  0xa6   :  { %44 = vst.msk [vmem:[%s121_s3] sm:$0xff] %vm43_vm1, %v42_v6 }
  0xa7   :  { %49 = vsyncpa [#allocation4], 1 }

</bundles_post_ra>
